<compile_context>
chip_gen: v6e
topology: v6e:2x2x1
jax: 0.10.0
libtpu: 0.0.40
codegen_flags: <defaults>
</compile_context>

<pallas_src>
import functools

import jax
import jax.numpy as jnp
from jax.experimental import pallas as pl
from jax.experimental.pallas import tpu as pltpu


# Per-block VMEM budget for one (TB, C, H*W) activation block.  Pallas
# double-buffers both the input and the output block, so the pipelined working
# set is ~4x this (~24 MiB) -- safe on v7x's 64 MiB VMEM/TC; v5e/v6e (128 MiB)
# could roughly double these numbers.
_DEFAULT_BLOCK_BUDGET = 6 * 1024 * 1024
_DEFAULT_VMEM_LIMIT = 48 * 1024 * 1024


# --------------------------------------------------------------------------
# Kernels
# --------------------------------------------------------------------------
def _se_fused_kernel(x_ref, w1_ref, w2_ref, o_ref, *, inv_hw):
    """Fused SE for one batch tile: x_ref (TB, C, HW) fully resident."""
    x = x_ref[...]                                              # (TB, C, HW)
    # Squeeze: global average pool over spatial dims (f32 accumulation).
    y = jnp.sum(x.astype(jnp.float32), axis=-1) * inv_hw        # (TB, C)
    # Excitation: Linear -> ReLU -> Linear -> Sigmoid (bias-free).  The MXU is
    # mostly padded here (C/r is tiny) but this is negligible vs. DMA time.
    h = jnp.maximum(
        jnp.dot(y, w1_ref[...], preferred_element_type=jnp.float32), 0.0)
    s = jax.nn.sigmoid(
        jnp.dot(h, w2_ref[...], preferred_element_type=jnp.float32))
    # Scale in the activation dtype (only the tiny s vector is cast).
    o_ref[...] = (x * s.astype(x.dtype)[:, :, None]).astype(o_ref.dtype)


def _pool_kernel(x_ref, p_ref, *, inv_hw):
    """Partial squeeze: per-(batch-tile, channel-chunk) spatial mean."""
    # x_ref: (TB, TC, HW) -> p_ref: (1, TB, TC)  (f32)
    pooled = jnp.sum(x_ref[...].astype(jnp.float32), axis=-1) * inv_hw
    p_ref[...] = pooled[None, :, :]


def _scale_kernel(s_ref, x_ref, o_ref):
    """Scale one (TB, TC, HW) tile of x by its per-channel sigmoid gate."""
    x = x_ref[...]                                              # (TB, TC, HW)
    s = s_ref[0]                                                # (TB, TC) f32
    o_ref[...] = (x * s.astype(x.dtype)[:, :, None]).astype(o_ref.dtype)


# --------------------------------------------------------------------------
# Tile selection helpers
# --------------------------------------------------------------------------
def _pick_fused_batch_tile(B, slab_bytes, budget):
    """Largest batch tile whose (TB, C, HW) block fits `budget`; prefer >=2
    grid steps so pipelining / megacore sharding have work to overlap."""
    fitting = [d for d in range(B, 0, -1) if B % d == 0 and d * slab_bytes <= budget]
    if not fitting:
        return None
    for d in fitting:                       # descending
        if B // d >= 2:
            return d
    return fitting[0]


def _pick_two_pass_tiles(B, C, HW, itemsize, budget):
    """Tiles for the two-pass path.  TB must be ==B or a multiple of 8 (it is
    the sublane dim of the (·, TB, TC) pooled block); TC must be ==C or a
    multiple of 8 (sublane dim of the (TB, TC, HW) activation block)."""
    tb_cands = [d for d in range(B, 0, -1) if B % d == 0 and (d == B or d % 8 == 0)]
    tc_cands = [d for d in range(C, 0, -1) if C % d == 0 and (d == C or d % 8 == 0)]
    tb_min = tb_cands[-1]
    tc = next((d for d in tc_cands if tb_min * d * HW * itemsize <= budget),
              tc_cands[-1])
    tb = next((d for d in tb_cands if d * tc * HW * itemsize <= budget), tb_min)
    return tb, tc


# --------------------------------------------------------------------------
# Pallas-call wrappers
# --------------------------------------------------------------------------
def _se_fused(x3, w1, w2, tb, vmem_limit):
    B, C, HW = x3.shape
    itemsize = x3.dtype.itemsize
    cr = w1.shape[1]
    nb = B // tb
    return pl.pallas_call(
        functools.partial(_se_fused_kernel, inv_hw=1.0 / HW),
        out_shape=jax.ShapeDtypeStruct(x3.shape, x3.dtype),
        grid=(nb,),
        in_specs=[
            pl.BlockSpec((tb, C, HW), lambda b: (b, 0, 0)),
            pl.BlockSpec((C, cr), lambda b: (0, 0)),   # weights stay resident
            pl.BlockSpec((cr, C), lambda b: (0, 0)),
        ],
        out_specs=pl.BlockSpec((tb, C, HW), lambda b: (b, 0, 0)),
        compiler_params=pltpu.CompilerParams(
            dimension_semantics=("parallel",),
            vmem_limit_bytes=vmem_limit),
        cost_estimate=pl.CostEstimate(
            flops=2 * B * C * HW + 4 * B * C * cr,
            transcendentals=B * C,
            bytes_accessed=2 * x3.size * itemsize + (w1.size + w2.size) * 4),
    )(x3, w1, w2)


def _se_two_pass(x3, w1, w2, budget, vmem_limit):
    """Fallback for shapes where one (C, HW) slab exceeds the VMEM budget.
    Costs one extra read of x over HBM (3 passes vs 2)."""
    B, C, HW = x3.shape
    itemsize = x3.dtype.itemsize
    tb, tc = _pick_two_pass_tiles(B, C, HW, itemsize, budget)
    nb, nc = B // tb, C // tc

    # Pass 1: partial spatial means, one (TB, TC) chunk per grid step.
    pooled = pl.pallas_call(
        functools.partial(_pool_kernel, inv_hw=1.0 / HW),
        out_shape=jax.ShapeDtypeStruct((nc, B, tc), jnp.float32),
        grid=(nb, nc),
        in_specs=[pl.BlockSpec((tb, tc, HW), lambda b, c: (b, c, 0))],
        out_specs=pl.BlockSpec((1, tb, tc), lambda b, c: (c, b, 0)),
        compiler_params=pltpu.CompilerParams(
            dimension_semantics=("parallel", "parallel"),
            vmem_limit_bytes=vmem_limit),
        cost_estimate=pl.CostEstimate(
            flops=B * C * HW, transcendentals=0,
            bytes_accessed=x3.size * itemsize + B * C * 4),
    )(x3)

    # Excitation on the tiny (B, C) pooled vector: negligible work, leave to XLA.
    y = pooled.transpose(1, 0, 2).reshape(B, C)                 # (B, C) f32
    h = jnp.maximum(y @ w1, 0.0)
    s = jax.nn.sigmoid(h @ w2)                                  # (B, C) f32
    s3 = s.reshape(B, nc, tc).transpose(1, 0, 2)                # (nc, B, tc)

    # Pass 2: stream x tile-by-tile and scale.
    return pl.pallas_call(
        _scale_kernel,
        out_shape=jax.ShapeDtypeStruct(x3.shape, x3.dtype),
        grid=(nb, nc),
        in_specs=[
            pl.BlockSpec((1, tb, tc), lambda b, c: (c, b, 0)),
            pl.BlockSpec((tb, tc, HW), lambda b, c: (b, c, 0)),
        ],
        out_specs=pl.BlockSpec((tb, tc, HW), lambda b, c: (b, c, 0)),
        compiler_params=pltpu.CompilerParams(
            dimension_semantics=("parallel", "parallel"),
            vmem_limit_bytes=vmem_limit),
        cost_estimate=pl.CostEstimate(
            flops=B * C * HW, transcendentals=0,
            bytes_accessed=2 * x3.size * itemsize + B * C * 4),
    )(s3, x3)


def se_layer(x, w_fc1, w_fc2, *, block_budget_bytes=_DEFAULT_BLOCK_BUDGET,
             vmem_limit_bytes=_DEFAULT_VMEM_LIMIT):
    """SELayer forward.  x: (B, C, H, W) NCHW.  w_fc1: (C//r, C), w_fc2:
    (C, C//r) in PyTorch Linear convention (out_features x in_features)."""
    B, C, H, W = x.shape
    HW = H * W
    x3 = x.reshape(B, C, HW)                    # H*W lane-dense last axis
    w1 = jnp.asarray(w_fc1, jnp.float32).T      # (C, C//r)
    w2 = jnp.asarray(w_fc2, jnp.float32).T      # (C//r, C)

    tb = _pick_fused_batch_tile(B, C * HW * x.dtype.itemsize, block_budget_bytes)
    if tb is not None:
        out3 = _se_fused(x3, w1, w2, tb, vmem_limit_bytes)
    else:
        out3 = _se_two_pass(x3, w1, w2, block_budget_bytes, vmem_limit_bytes)
    return out3.reshape(B, C, H, W)


if __name__ == "__main__":
    # Small shapes consistent with SELayer(channel=32, reduction=16).
    B, C, H, W = 2, 32, 8, 8
    reduction = 16
    C_red = C // reduction  # 2

    key = jax.random.PRNGKey(0)
    kx, k1, k2 = jax.random.split(key, 3)

    x = jax.random.normal(kx, (B, C, H, W), dtype=jnp.float32)
    # PyTorch Linear convention: (out_features, in_features), bias-free.
    w_fc1 = jax.random.normal(k1, (C_red, C), dtype=jnp.float32) * 0.1
    w_fc2 = jax.random.normal(k2, (C, C_red), dtype=jnp.float32) * 0.1

    # Pure-JAX reference.
    y_ref = jnp.mean(x, axis=(2, 3))                         # (B, C)
    h_ref = jnp.maximum(y_ref @ w_fc1.T, 0.0)                # (B, C//r)
    s_ref = jax.nn.sigmoid(h_ref @ w_fc2.T)                  # (B, C)
    ref = x * s_ref[:, :, None, None]

    se_jit = jax.jit(se_layer,
                     static_argnames=("block_budget_bytes", "vmem_limit_bytes"))

    # Default (fused, batch-pipelined) path.
    out = se_jit(x, w_fc1, w_fc2)
    jax.block_until_ready(out)
    assert out.shape == x.shape and out.dtype == x.dtype
    assert jnp.allclose(out, ref, atol=1e-5, rtol=1e-5), "fused path mismatch"

    # Force the two-pass fallback (used when a (C, H*W) slab would not fit the
    # per-block VMEM budget) to make sure it also runs and matches.
    out2 = se_jit(x, w_fc1, w_fc2, block_budget_bytes=1)
    jax.block_until_ready(out2)
    assert jnp.allclose(out2, ref, atol=1e-5, rtol=1e-5), "two-pass mismatch"

    print("KERNEL_OK")
</pallas_src>

<mosaic_0001>
module attributes {stable_mosaic.version = 11 : i64} {
  func.func @_se_fused_kernel(%arg0: i32, %arg1: memref<1x32x64xf32, #tpu.memory_space<vmem>>, %arg2: memref<32x2xf32, #tpu.memory_space<vmem>>, %arg3: memref<2x32xf32, #tpu.memory_space<vmem>>, %arg4: memref<1x32x64xf32, #tpu.memory_space<vmem>>) attributes {dimension_semantics = [#tpu.dimension_semantics<parallel>], iteration_bounds = array<i64: 2>, scalar_prefetch = 0 : i64, scratch_operands = 0 : i64, tpu.core_type = #tpu.core_type<tc>, window_params = [{transform_indices = @transform_0, window_bounds = array<i64: 1, 32, 64>}, {pipeline_mode = #tpu.pipeline_mode<synchronous>, transform_indices = @transform_1, window_bounds = array<i64: 32, 2>}, {pipeline_mode = #tpu.pipeline_mode<synchronous>, transform_indices = @transform_2, window_bounds = array<i64: 2, 32>}, {transform_indices = @transform_3, window_bounds = array<i64: 1, 32, 64>}]} {
    %c0 = arith.constant 0 : index
    %c0_0 = arith.constant 0 : index
    %c0_1 = arith.constant 0 : index
    %0 = vector.load %arg1[%c0, %c0_0, %c0_1] : memref<1x32x64xf32, #tpu.memory_space<vmem>>, vector<1x32x64xf32>
    %cst = arith.constant dense<0.000000e+00> : vector<1x32xf32>
    %1 = vector.multi_reduction <add>, %0, %cst [2] : vector<1x32x64xf32> to vector<1x32xf32>
    %cst_2 = arith.constant 1.562500e-02 : f32
    %2 = vector.broadcast %cst_2 : f32 to vector<1x32xf32>
    %3 = arith.mulf %1, %2 : vector<1x32xf32>
    %c0_3 = arith.constant 0 : index
    %c0_4 = arith.constant 0 : index
    %4 = vector.load %arg2[%c0_3, %c0_4] : memref<32x2xf32, #tpu.memory_space<vmem>>, vector<32x2xf32>
    %cst_5 = arith.constant dense<0.000000e+00> : vector<1x2xf32>
    %5 = tpu.matmul %3, %4, %cst_5 {dimension_numbers = #tpu.dot_dimension_numbers<[1], [0], [0], [1], [0, 0, 1, 1], [], []>} : vector<1x32xf32>, vector<32x2xf32>, vector<1x2xf32> -> vector<1x2xf32>
    %cst_6 = arith.constant 0.000000e+00 : f32
    %6 = vector.broadcast %cst_6 : f32 to vector<1x2xf32>
    %7 = arith.maximumf %5, %6 : vector<1x2xf32>
    %c0_7 = arith.constant 0 : index
    %c0_8 = arith.constant 0 : index
    %8 = vector.load %arg3[%c0_7, %c0_8] : memref<2x32xf32, #tpu.memory_space<vmem>>, vector<2x32xf32>
    %cst_9 = arith.constant dense<0.000000e+00> : vector<1x32xf32>
    %9 = tpu.matmul %7, %8, %cst_9 {dimension_numbers = #tpu.dot_dimension_numbers<[1], [0], [0], [1], [0, 0, 1, 1], [], []>} : vector<1x2xf32>, vector<2x32xf32>, vector<1x32xf32> -> vector<1x32xf32>
    %10 = arith.negf %9 : vector<1x32xf32>
    %11 = math.exp %10 : vector<1x32xf32>
    %cst_10 = arith.constant 1.000000e+00 : f32
    %12 = vector.broadcast %cst_10 : f32 to vector<1x32xf32>
    %13 = arith.addf %12, %11 : vector<1x32xf32>
    %14 = arith.divf %12, %13 : vector<1x32xf32>
    %15 = vector.shape_cast %14 : vector<1x32xf32> to vector<1x32x1xf32>
    %16 = vector.broadcast %15 : vector<1x32x1xf32> to vector<1x32x64xf32>
    %17 = arith.mulf %0, %16 : vector<1x32x64xf32>
    %c0_11 = arith.constant 0 : index
    %c0_12 = arith.constant 0 : index
    %c0_13 = arith.constant 0 : index
    %18 = vector.load %arg4[%c0_11, %c0_12, %c0_13] : memref<1x32x64xf32, #tpu.memory_space<vmem>>, vector<1x32x64xf32>
    tpu.vector_store %arg4[%c0_11, %c0_12, %c0_13], %17 {strides = array<i32>} : memref<1x32x64xf32, #tpu.memory_space<vmem>>, vector<1x32x64xf32>,
    return
  }
  func.func @transform_0(%arg0: i32) -> (i32, i32, i32) {
    %c0_i32 = arith.constant 0 : i32
    %c0_i32_0 = arith.constant 0 : i32
    %c0_i32_1 = arith.constant 0 : i32
    return %arg0, %c0_i32, %c0_i32_0 : i32, i32, i32
  }
  func.func @transform_1(%arg0: i32) -> (i32, i32) {
    %c0_i32 = arith.constant 0 : i32
    %c0_i32_0 = arith.constant 0 : i32
    %c0_i32_1 = arith.constant 0 : i32
    return %c0_i32, %c0_i32_0 : i32, i32
  }
  func.func @transform_2(%arg0: i32) -> (i32, i32) {
    %c0_i32 = arith.constant 0 : i32
    %c0_i32_0 = arith.constant 0 : i32
    %c0_i32_1 = arith.constant 0 : i32
    return %c0_i32, %c0_i32_0 : i32, i32
  }
  func.func @transform_3(%arg0: i32) -> (i32, i32, i32) {
    %c0_i32 = arith.constant 0 : i32
    %c0_i32_0 = arith.constant 0 : i32
    %c0_i32_1 = arith.constant 0 : i32
    return %arg0, %c0_i32, %c0_i32_0 : i32, i32, i32
  }
}

</mosaic_0001>

<bundles_post_ra>
// kernel: se_layer.1
= control target key start
LH: loop header
LB: loop body
LE: loop exit
PB: predicated region body
PF: predicated region fallthrough
CT: control target
= control target key end

     0   :  { %s552_s12 = smov 0   ;;  %s615_s0 = inlined_call_operand.vmem [shape: f32[2,32,64], index: 0, kind: input, shape index: {}]   ;;  %s616_s1 = inlined_call_operand.vmem [shape: f32[32,2], index: 1, kind: input, shape index: {}]   ;;  %s617_s2 = inlined_call_operand.vmem [shape: f32[2,32], index: 2, kind: input, shape index: {}]   ;;  %s618_s3 = inlined_call_operand.vmem [shape: f32[2,32,64], index: 3, kind: output, shape index: {}]  }
   0x1 LB: > { %s468_s13 = sadd.s32 4294967295, %s528_s12   ;;  %p472_p0 = scmp.ge.s32.totalorder %s528_s12, 1  ;;  %s528_s12 = sphi %s552_s12, %s13_s12  }
   0x2   : > { %p137_p1 = scmp.lt.s32.totalorder %s528_s12, 3 }
   0x4   : > { %p138_p2 = pnand %p472_p0, %p137_p1 }
   0x5   : > { %p161_p3 = scmp.lt.s32.totalorder (!%p138_p2), %s468_s13, 1 }
   0x6   : > { %141 = sbr.rel (%p138_p2) target bundleno = 713 (0x2c9), region = 32 }
   0xb   : > { %s620_s13 = smov (!%p161_p3, %s468_s13), 1  ;;  %vm175_vm0 = vcmask 523264   ;;  %v530_v8 = vmov 0.0   ;;  %v195_v9 = vld [vmem:[%s616_s1 + $0x18] sm:$0xff]  ;;  %v194_v10 = vld [vmem:[%s616_s1 + $0x10] sm:$0xff]  ;;  %v193_v11 = vld [vmem:[%s616_s1 + $0x8] sm:$0xff]  ;;  %v200_v13 = vlaneseq }
   0xc   : > { %s483_s14 = sshll.u32 %s620_s13, 5  ;;  %492 = vmatprep.subr.mxu0 %v530_v8  ;;  %503 = vmatprep.subr.mxu1 %v530_v8  ;;  %v192_v12 = vld [vmem:[%s616_s1] sm:$0xff]  ;;  %vm531_vm1 = vmmov 0   ;;  %vm211_vm2 = vcmask 130112   ;;  %vm218_vm3 = vcmask 195712   ;;  %vm225_vm4 = vcmask 261312  }
   0xd   : > { %s165_s17 = scalar_lea.vmem %s615_s0, %s483_s14  ;;  %493 = vmatpush3.msra.mxu0 %v195_v9  ;;  %500 = vmatprep.mubr.msk.f32.mxu0 %vm531_vm1, %v530_v8  ;;  %v201_v14 = vand.u32 127, %v200_v13  ;;  %v203_v15 = vshrl.u32 %v200_v13, 7  ;;  %vm227_vm5 = vcmask 261120   ;;  %v301_v38 = vld [vmem:[%s617_s2] sm:$0x3]  ;;  %vm306_vm6 = vcmask 1041408   ;;  %s170_s30 = scalar_lea.vmem %s618_s3, %s483_s14 }
   0xe   : > { %v568_v0 = vld [vmem:[%s165_s17] sm:$0xff]  ;;  %v570_v1 = vld [vmem:[%s165_s17 + $0x10] sm:$0xff]  ;;  %v572_v2 = vld [vmem:[%s165_s17 + $0x8] sm:$0xff]  ;;  %494 = vmatprep.subr.mxu0 %v530_v8  ;;  %505 = vmatprep.mubr.msk.f32.mxu1 %vm531_vm1, %v530_v8  ;;  %vm302_vm7 = vcmask 15360  }
   0xf   : > { %v176_v3 = vsel %vm175_vm0, %v568_v0, 0.0  ;;  %v182_v4 = vsel %vm175_vm0, %v570_v1, 0.0  ;;  %v578_v5 = vld [vmem:[%s165_s17 + $0x18] sm:$0xff]  ;;  %v179_v6 = vsel %vm175_vm0, %v572_v2, 0.0  ;;  %495 = vmatpush3.msra.mxu0 %v194_v10  ;;  %v206_v16 = vadd.s32 4294967288, %v201_v14  ;;  %504 = vmatpush3.msk.msra.mxu1 %vm306_vm6, %v301_v38 }
  0x10   : > { %177 = vadd.xlane.f32.xlu0 %v176_v3  ;;  %183 = vadd.xlane.f32.xlu1 %v182_v4  ;;  %v185_v7 = vsel %vm175_vm0, %v578_v5, 0.0  ;;  %v220_v17 = vadd.s32 4294967272, %v201_v14  ;;  %v213_v19 = vadd.s32 4294967280, %v201_v14  ;;  %v204_v21 = vsub.s32 %v201_v14, %v203_v15 }
  0x11   : > { %496 = vmatprep.subr.mxu0 %v530_v8  ;;  %v209_v23 = vsub.s32 %v206_v16, %v203_v15  ;;  %v388_v47 = vsub.s32 0, %v203_v15 }
  0x12   : > { %497 = vmatpush3.msra.mxu0 %v193_v11  ;;  %v223_v24 = vsub.s32 %v220_v17, %v203_v15  ;;  %v216_v25 = vsub.s32 %v213_v19, %v203_v15 }
  0x13   : > { %498 = vmatprep.subr.mxu0 %v530_v8 }
  0x14   : > { %180 = vadd.xlane.f32.xlu0 %v179_v6  ;;  %186 = vadd.xlane.f32.xlu1 %v185_v7 }
  0x15   : > { %499 = vmatpush3.msra.mxu0 %v192_v12 }
  0x99   : > { %v178_v18 = vpop.xlane.xlu0 %177  ;;  %v184_v20 = vpop.xlane.xlu1 %183 }
  0x9a   : > { %v188_v22 = vmul.f32 0.015625, %v178_v18  ;;  %v190_v26 = vmul.f32 0.015625, %v184_v20 }
  0x9c   : > { %v205_v31 = vrot.slane %v188_v22, %v204_v21  ;;  %v217_v34 = vrot.slane %v190_v26, %v216_v25 }
  0x9d   : > { %v181_v27 = vpop.xlane.xlu0 %180  ;;  %v187_v28 = vpop.xlane.xlu1 %186 }
  0x9e   : > { %v189_v29 = vmul.f32 0.015625, %v181_v27  ;;  %v191_v30 = vmul.f32 0.015625, %v187_v28 }
  0xa0   : > { %v210_v32 = vrot.slane %v189_v29, %v209_v23  ;;  %v224_v33 = vrot.slane %v191_v30, %v223_v24 }
  0xa2   : > { %v212_v35 = vsel %vm211_vm2, %v210_v32, %v205_v31 }
  0xa3   : > { %v219_v36 = vsel %vm218_vm3, %v217_v34, %v212_v35 }
  0xa4   : > { %v226_v37 = vsel %vm225_vm4, %v224_v33, %v219_v36 }
  0xa5   : > { %501 = vmatmul.mubr.msk.f32.vlgmr.msra.gmra.mxu0 %vm227_vm5, %v226_v37 }
 0x165   : > { %v296_v39 = vpop.f32.mrf.mxu0 }
 0x166   : > { %v300_v40 = vmax.f32 %v296_v39, 0.0 }
 0x167   : > { %v502_v41 = vpop.f32.mrf.mxu0 }
 0x168   : > { %506 = vmatmul.mubr.msk.f32.vlgmr.msra.gmra.mxu1 %vm302_vm7, %v300_v40 }
 0x228   : > { %v376_v42 = vpop.f32.mrf.mxu1 }
 0x229   : > { %v480_v43 = vmul.f32 -1.442695, %v376_v42 }
 0x22a   : > { %v507_v44 = vpop.f32.mrf.mxu1 }
 0x22b   : > { %518 = vpow2.f32 %v480_v43 }
 0x238   : > { %v519_v45 = vpop.eup %518 }
 0x239   : > { %v383_v46 = vadd.f32 1.0, %v519_v45 }
 0x23b   : > { %520 = vrcp.f32 %v383_v46 }
 0x248   : > { %v521_v48 = vpop.eup %520 }
 0x249   : > { %v389_v49 = vrot.slane %v521_v48, %v388_v47 }
 0x24b   : > { %395 = vbcast.lane.b32.xlu1 %v389_v49, 264  ;;  %391 = vbcast.lane.b32.xlu0 %v389_v49, 256 }
 0x24f   : > { %399 = vbcast.lane.b32.xlu1 %v389_v49, 272 }
 0x253   : > { %403 = vbcast.lane.b32.xlu1 %v389_v49, 280 }
 0x2bd   : > { %v396_v50 = vpop.permute.xlu1 %395  ;;  %v392_v51 = vpop.permute.xlu0 %391 }
 0x2be   : > { %v406_v52 = vmul.f32 %v396_v50, %v572_v2  ;;  %v405_v53 = vmul.f32 %v392_v51, %v568_v0 }
 0x2c0   : > { %410 = vst.msk [vmem:[%s170_s30 + $0x8] sm:$0xff] %vm175_vm0, %v406_v52  ;;  %409 = vst.msk [vmem:[%s170_s30] sm:$0xff] %vm175_vm0, %v405_v53 }
 0x2c1   : > { %v400_v54 = vpop.permute.xlu1 %399 }
 0x2c2   : > { %v407_v55 = vmul.f32 %v400_v54, %v570_v1 }
 0x2c4   : > { %411 = vst.msk [vmem:[%s170_s30 + $0x10] sm:$0xff] %vm175_vm0, %v407_v55 }
 0x2c5   : > { %v404_v56 = vpop.permute.xlu1 %403 }
 0x2c6   : > { %v408_v57 = vmul.f32 %v404_v56, %v578_v5 }
 0x2c8   : > { %412 = vst.msk [vmem:[%s170_s30 + $0x18] sm:$0xff] %vm175_vm0, %v408_v57 }
 0x2c9 PF: > { %s13_s12 = sadd.s32 1, %s528_s12  }
 0x2ca   : > { %p10_p4 = scmp.ge.s32.totalorder %s13_s12, 4  }
 0x2cc   :  { %12 = sbr.rel (!%p10_p4) target bundleno = 1 (0x1), region = 62 }

</bundles_post_ra>
